<compile_context>
chip_gen: v5e
topology: v5e:2x2
jax: 0.10.0
libtpu: 0.0.40
codegen_flags: <defaults>
</compile_context>

<pallas_src>
import functools

import jax
import jax.numpy as jnp
from jax.experimental import pallas as pl
from jax.experimental.pallas import tpu as pltpu


def _round_down(x: int, m: int) -> int:
    return (x // m) * m


def _avg_pool_kernel(x_ref, o_ref, *, inv_hw):
    # x_ref: (TILE_R, H*W) tile in VMEM; o_ref: (1, TILE_R) lane-dense means.
    x = x_ref[...].astype(jnp.float32)
    s = jnp.sum(x, axis=-1)  # (TILE_R,)
    o_ref[...] = (s * inv_hw).astype(o_ref.dtype)[None, :]


def _avg_pool_chunked_kernel(x_ref, o_ref, acc_ref, *, inv_hw, hw, chunk_hw,
                             needs_mask):
    # Grid = (row tiles, spatial chunks); spatial chunk axis is the reduction
    # axis (last, "arbitrary").  acc_ref: (1, TILE_R) f32 running sum.
    k = pl.program_id(1)

    @pl.when(k == 0)
    def _init():
        acc_ref[...] = jnp.zeros_like(acc_ref)

    x = x_ref[...].astype(jnp.float32)
    if needs_mask:
        # Zero out padded lanes of the final (partial) spatial chunk.
        lane = jax.lax.broadcasted_iota(jnp.int32, x.shape, 1) + k * chunk_hw
        x = jnp.where(lane < hw, x, 0.0)
    acc_ref[...] += jnp.sum(x, axis=-1)[None, :]

    @pl.when(k == pl.num_programs(1) - 1)
    def _finalize():
        o_ref[...] = (acc_ref[...] * inv_hw).astype(o_ref.dtype)


def global_avg_pool2d(x: jax.Array, *,
                      tile_budget_bytes: int = 2 * 1024 * 1024) -> jax.Array:
    """Pallas equivalent of the PyTorch GlobalAvgPool2d forward."""
    B, C, H, W = x.shape
    rows = B * C
    hw = H * W
    x2 = x.reshape(rows, hw)
    itemsize = x2.dtype.itemsize
    inv_hw = 1.0 / float(hw)
    row_bytes = hw * itemsize

    cost = pl.CostEstimate(
        flops=rows * hw,
        transcendentals=0,
        bytes_accessed=rows * hw * itemsize + rows * itemsize,
    )

    if 128 * row_bytes <= tile_budget_bytes:
        # ---- Path A: tile only the rows axis; full H*W per tile. ----
        tile_r = _round_down(tile_budget_bytes // row_bytes, 128)
        if tile_r >= rows or rows <= 128:
            tile_r = rows  # full-extent block (always legal)
        grid = (pl.cdiv(rows, tile_r),)
        out = pl.pallas_call(
            functools.partial(_avg_pool_kernel, inv_hw=inv_hw),
            out_shape=jax.ShapeDtypeStruct((1, rows), x.dtype),
            grid_spec=pltpu.PrefetchScalarGridSpec(
                num_scalar_prefetch=0,
                grid=grid,
                in_specs=[pl.BlockSpec((tile_r, hw), lambda i: (i, 0))],
                out_specs=pl.BlockSpec((1, tile_r), lambda i: (0, i)),
            ),
            compiler_params=pltpu.CompilerParams(
                dimension_semantics=("parallel",),
            ),
            cost_estimate=cost,
        )(x2)
    else:
        # ---- Path B: also chunk the spatial axis (reduction axis, last). ----
        tile_r = rows if rows <= 128 else 128
        chunk_hw = max(
            128, _round_down(tile_budget_bytes // (tile_r * itemsize), 128))
        if chunk_hw >= hw:
            chunk_hw = hw
        needs_mask = (hw % chunk_hw) != 0
        grid = (pl.cdiv(rows, tile_r), pl.cdiv(hw, chunk_hw))
        out = pl.pallas_call(
            functools.partial(
                _avg_pool_chunked_kernel,
                inv_hw=inv_hw, hw=hw, chunk_hw=chunk_hw, needs_mask=needs_mask,
            ),
            out_shape=jax.ShapeDtypeStruct((1, rows), x.dtype),
            grid_spec=pltpu.PrefetchScalarGridSpec(
                num_scalar_prefetch=0,
                grid=grid,
                in_specs=[pl.BlockSpec((tile_r, chunk_hw),
                                       lambda i, k: (i, k))],
                out_specs=pl.BlockSpec((1, tile_r), lambda i, k: (0, i)),
                scratch_shapes=[pltpu.VMEM((1, tile_r), jnp.float32)],
            ),
            compiler_params=pltpu.CompilerParams(
                dimension_semantics=("parallel", "arbitrary"),
            ),
            cost_estimate=cost,
        )(x2)

    return out.reshape(B, C, 1, 1)


if __name__ == "__main__":
    key = jax.random.PRNGKey(0)
    k1, k2, k3 = jax.random.split(key, 3)

    def _check(x, **kw):
        y = global_avg_pool2d(x, **kw)
        jax.block_until_ready(y)
        ref = jnp.mean(x, axis=(2, 3), keepdims=True)
        assert y.shape == ref.shape, (y.shape, ref.shape)
        assert jnp.allclose(y, ref, rtol=1e-5, atol=1e-5), "mismatch vs ref"
        return y

    # 1) Standard small shape (single-axis path, one row tile).
    x1 = jax.random.normal(k1, (2, 4, 16, 16), dtype=jnp.float32)
    _check(x1)

    # 2) Exercise the spatial-chunked reduction path (incl. masked 288 % 128
    #    tail) at a small shape by forcing a tiny tile budget.
    x2 = jax.random.normal(k2, (2, 4, 16, 18), dtype=jnp.float32)
    _check(x2, tile_budget_bytes=4096)

    # 3) Exercise multi-tile rows grid with a padded (partial) last row tile.
    x3 = jax.random.normal(k3, (4, 50, 8, 8), dtype=jnp.float32)
    _check(x3, tile_budget_bytes=128 * 8 * 8 * 4)

    print("KERNEL_OK")
</pallas_src>

<mosaic_0001>
module attributes {stable_mosaic.version = 11 : i64} {
  func.func @_avg_pool_kernel(%arg0: i32, %arg1: memref<8x256xf32, #tpu.memory_space<vmem>>, %arg2: memref<1x8xf32, #tpu.memory_space<vmem>>) attributes {dimension_semantics = [#tpu.dimension_semantics<parallel>], iteration_bounds = array<i64: 1>, scalar_prefetch = 0 : i64, scratch_operands = 0 : i64, tpu.core_type = #tpu.core_type<tc>, window_params = [{transform_indices = @transform_0, window_bounds = array<i64: 8, 256>}, {transform_indices = @transform_1, window_bounds = array<i64: 1, 8>}]} {
    %c0 = arith.constant 0 : index
    %c0_0 = arith.constant 0 : index
    %0 = vector.load %arg1[%c0, %c0_0] : memref<8x256xf32, #tpu.memory_space<vmem>>, vector<8x256xf32>
    %cst = arith.constant dense<0.000000e+00> : vector<8xf32>
    %1 = vector.multi_reduction <add>, %0, %cst [1] : vector<8x256xf32> to vector<8xf32>
    %cst_1 = arith.constant 3.906250e-03 : f32
    %2 = vector.broadcast %cst_1 : f32 to vector<8xf32>
    %3 = arith.mulf %1, %2 : vector<8xf32>
    %4 = vector.shape_cast %3 : vector<8xf32> to vector<1x8xf32>
    %c0_2 = arith.constant 0 : index
    %c0_3 = arith.constant 0 : index
    %5 = vector.load %arg2[%c0_2, %c0_3] : memref<1x8xf32, #tpu.memory_space<vmem>>, vector<1x8xf32>
    tpu.vector_store %arg2[%c0_2, %c0_3], %4 {strides = array<i32>} : memref<1x8xf32, #tpu.memory_space<vmem>>, vector<1x8xf32>,
    return
  }
  func.func @transform_0(%arg0: i32) -> (i32, i32) {
    %c0_i32 = arith.constant 0 : i32
    %c0_i32_0 = arith.constant 0 : i32
    return %arg0, %c0_i32 : i32, i32
  }
  func.func @transform_1(%arg0: i32) -> (i32, i32) {
    %c0_i32 = arith.constant 0 : i32
    %c0_i32_0 = arith.constant 0 : i32
    return %c0_i32, %arg0 : i32, i32
  }
}

</mosaic_0001>

<bundles_post_ra>
// kernel: tpu_custom_call.1
= control target key start
LH: loop header
LB: loop body
LE: loop exit
PB: predicated region body
PF: predicated region fallthrough
CT: control target
= control target key end

     0   :  { %6 = vsyncpa [#allocation3], 0  ;;  %s125_s0 = inlined_call_operand.hbm [shape: f32[8,256], index: 0, kind: input, shape index: {}]   ;;  %s126_s1 = inlined_call_operand.hbm [shape: f32[1,8], index: 1, kind: output, shape index: {}]  }
   0x1   :  { %7 = vsyncpa [#allocation4], 0  ;;  %s13_s8 = sshll.u32 %s125_s0, 4  ;;  %s107_s9 = smov [#allocation2]   ;;  %s14_s8 = int_to_ptr.hbm [resolvable:$true] %s13_s8 }
   0x2   :  { %s15_s10 = sshll.u32 %s107_s9, 4  ;;  %s16_s10 = int_to_ptr.vmem [resolvable:$true] %s15_s10 }
   0x3   :  { %18 = dma.hbm_to_vmem [thread:$0]  %s14_s8, 256, %s16_s10, [#allocation3]  }
   0x4   :  { %103 = dma.done.wait [#allocation3], 256  }
   0x5   :  { %104 = vsyncadd [#allocation3], 4294967040  ;;  %v23_v0 = vld [vmem:[#allocation2] sm:$0xff]  ;;  %v24_v1 = vld [vmem:[#allocation2 + $0x8] sm:$0xff]  ;;  %v30_v3 = vlaneseq  ;;  %s108_s11 = smov [#allocation5]   ;;  %s43_s0 = sshll.u32 %s126_s1, 4  ;;  %s44_s0 = int_to_ptr.hbm [resolvable:$true] %s43_s0 }
   0x6   :  { %v25_v2 = vadd.f32 %v24_v1, %v23_v0  ;;  %s41_s12 = sshll.u32 %s108_s11, 4  ;;  %vm34_vm0 = vcmask 57344   ;;  %s42_s12 = int_to_ptr.vmem [resolvable:$true] %s41_s12 }
   0x7   :  { %v31_v4 = vand.u32 127, %v30_v3 }
   0x8   :  { %26 = vadd.xlane.f32.xlu0 %v25_v2 }
  0x7b   :  { %v27_v5 = vpop.xlane.xlu0 %26 }
  0x7c   :  { %v28_v6 = vmul.f32 0.00390625, %v27_v5 }
  0x7e   :  { %v32_v7 = vperm.slane %v28_v6, %v31_v4 }
  0x80   :  { %35 = vst.msk [vmem:[#allocation5] sm:$0x1] %vm34_vm0, %v32_v7 }
  0x81   :  { %46 = dma.vmem_to_hbm [thread:$0]  %s42_s12, 16, %s44_s0, [#allocation4]  }
  0x82   :  { %105 = dma.done.wait [#allocation4], 16  }
  0x83   :  { %106 = vsyncadd [#allocation4], 4294967280 }
  0x84   :  { %51 = vsyncpa [#allocation3], 1 }
  0x85   :  { %52 = vsyncpa [#allocation4], 1 }

</bundles_post_ra>
